<compile_context>
chip_gen: v5e
topology: v5e:2x2
jax: 0.10.0
libtpu: 0.0.40
codegen_flags: <defaults>
</compile_context>

<pallas_src>
import functools

import jax
import jax.numpy as jnp
from jax import lax
from jax.experimental import pallas as pl
from jax.experimental.pallas import tpu as pltpu


def _simclr_loss_kernel(z_hbm, o_ref, zstage_ref, zh_ref, dma_sem, acc_ref, *,
                        batch_size, inv_temperature, tile_m, outer):
    c = pl.program_id(0)                 # outer split (one per TensorCore)
    i = pl.program_id(1)                 # row-tile index within the split
    inner = pl.num_programs(1)
    inv_t = jnp.float32(inv_temperature)

    # ---- one-time (per core) setup -----------------------------------------
    @pl.when(i == 0)
    def _init():
        # Single DMA of z (its index never changes, so no pipelined buffers).
        cp = pltpu.make_async_copy(z_hbm, zstage_ref, dma_sem)
        cp.start()
        cp.wait()
        z = zstage_ref[...]                                        # (N, D) f32
        sq = jnp.sum(z * z, axis=-1, keepdims=True)                # (N, 1)
        # rsqrt (EUP) + multiply instead of sqrt + divide; clamp matches the
        # reference max(||z||, 1e-8).  1/temperature folded in as sqrt so the
        # hot-loop matmul directly produces cos/T.
        scale = lax.rsqrt(jnp.maximum(sq, 1e-16)) * jnp.float32(
            float(inv_temperature) ** 0.5)
        zq = z * scale                                             # (N, D) f32
        zh_ref[...] = zq.astype(zh_ref.dtype)                      # bf16 store

        # Positive logits pos[r] = <zq[r], zq[(r+B) mod N]> = cos/T, in f32.
        # Each outer split owns exactly one contiguous half of the rows, so
        # its positive-sum is sum(ph) (outer=2) or 2*sum(ph) (outer=1).  Seed
        # it into the accumulator; the hot loop never touches positives.
        ph = jnp.sum(zq[:batch_size] * zq[batch_size:], axis=-1, keepdims=True)
        pos_sum = jnp.sum(ph) * jnp.float32(2.0 / outer)
        row = lax.broadcasted_iota(jnp.int32, (tile_m, 1), 0)
        acc_ref[...] = jnp.where(row == 0, -pos_sum, jnp.float32(0.0))
        o_ref[...] = jnp.zeros_like(o_ref)     # never leave the output block
        #                                        uninitialized

    # ---- this step's row tile ----------------------------------------------
    row0 = pl.multiple_of((c * inner + i) * tile_m, tile_m)
    q = zh_ref[pl.ds(row0, tile_m), :]                          # (TM, D) bf16
    k = zh_ref[...]                                             # (N,  D) bf16
    sim = jnp.einsum('md,nd->mn', q, k,
                     preferred_element_type=jnp.float32)        # (TM, N) cos/T

    # cos(r, r) = 1, so the self-similarity entry is exactly 1/T and is the
    # row maximum: use it as the logsumexp stabilizer and subtract its
    # exp(0) = 1 contribution instead of building an explicit diagonal mask.
    s = jnp.sum(jnp.exp(sim - inv_t), axis=-1, keepdims=True) - 1.0
    lse = inv_t + jnp.log(jnp.maximum(s, jnp.float32(1e-20)))   # (TM, 1)
    acc_ref[...] += lse

    # ---- finalize: this core's partial loss (already divided by N) ---------
    @pl.when(i == inner - 1)
    def _fin():
        lane = lax.broadcasted_iota(jnp.int32, (1, 128), 1)
        total = jnp.sum(acc_ref[...]) / jnp.float32(2 * batch_size)
        o_ref[...] = jnp.where(lane == 0, total, jnp.float32(0.0))


def _device_kind():
    try:
        return jax.devices()[0].device_kind.lower()
    except Exception:
        return ""


def _detect_num_tensorcores(kind):
    # Single-TensorCore chips: v5e ("v5 lite"), v6e ("v6 lite"/"v6e").
    if ("lite" in kind) or ("v5e" in kind) or ("v6" in kind):
        return 1
    # Dual-TensorCore chips: megacore v4/v5p, v7x (2 TCs per chip).
    if ("v7" in kind) or ("v5p" in kind) or ("v5" in kind) or ("v4" in kind):
        return 2
    return 1


def _pick_row_tile(n, cap):
    """Largest divisor of n <= cap, preferring multiples of 16 (bf16 sublane
    packing), then multiples of 8, then any divisor."""
    cap = max(1, min(cap, n))
    for step in (16, 8, 1):
        best = 0
        t = step
        while t <= cap:
            if n % t == 0:
                best = t
            t += step
        if best:
            return best
    return 1


def simclr_loss(z_i, z_j, temperature, *, matmul_dtype=jnp.bfloat16,
                max_row_tile=None, num_cores=None):
    """Pallas implementation of SimCLR_Loss.forward(z_i, z_j)."""
    assert z_i.shape == z_j.shape and z_i.ndim == 2
    batch_size, d = z_i.shape
    n = 2 * batch_size
    z = jnp.concatenate([z_i, z_j], axis=0).astype(jnp.float32)   # (N, D)

    kind = _device_kind()
    is_v7x = "v7" in kind
    if num_cores is None:
        num_cores = _detect_num_tensorcores(kind)
    # v7x: 64 MiB VMEM per TensorCore; v5e/v6e: 128 MiB.  Leave headroom.
    vmem_cap = ((64 << 20) if is_v7x else (128 << 20)) - (12 << 20)
    if max_row_tile is None:
        max_row_tile = 256 if is_v7x else 512

    mm_bytes = jnp.dtype(matmul_dtype).itemsize
    d_pad, n_pad = max(d, 128), max(n, 128)

    def vmem_est(tm):
        return int(n * d_pad * 4              # f32 DMA staging for z
                   + n * d_pad * mm_bytes     # resident zh (1/T folded)
                   + 3 * tm * n_pad * 4       # live (TM, N) f32 slabs per step
                   + tm * 128 * 4             # (TM, 1) accumulator (lane pad)
                   + (2 << 20))               # slack

    # TODO(synk): for very large N on v7x, add column tiling with an online
    # (flash-style) logsumexp so per-step temporaries are (TM, TN), not (TM, N).
    tile_m = _pick_row_tile(n, max_row_tile)
    while tile_m > 16 and vmem_est(tile_m) > vmem_cap:
        tile_m = _pick_row_tile(n, max(16, tile_m // 2))

    n_tiles = n // tile_m
    outer = 2 if (num_cores >= 2 and n_tiles % 2 == 0) else 1
    inner = n_tiles // outer
    vmem_limit = int(min(max(vmem_est(tile_m), 16 << 20), vmem_cap))

    kernel = functools.partial(
        _simclr_loss_kernel,
        batch_size=batch_size,
        inv_temperature=1.0 / float(temperature),
        tile_m=tile_m,
        outer=outer,
    )

    out = pl.pallas_call(
        kernel,
        out_shape=jax.ShapeDtypeStruct((1, outer * 128), jnp.float32),
        grid_spec=pltpu.PrefetchScalarGridSpec(
            num_scalar_prefetch=0,
            grid=(outer, inner),
            in_specs=[pl.BlockSpec(memory_space=pl.ANY)],   # z stays in HBM
            out_specs=pl.BlockSpec((1, 128), lambda c, i: (0, c)),
            scratch_shapes=[
                pltpu.VMEM((n, d), jnp.float32),       # DMA landing for z
                pltpu.VMEM((n, d), matmul_dtype),      # zh * sqrt(1/T), resident
                pltpu.SemaphoreType.DMA,               # init DMA semaphore
                pltpu.VMEM((tile_m, 1), jnp.float32),  # per-row loss accumulator
            ],
        ),
        # TODO(synk): on v7x, verify via xprof that the leading "parallel" axis
        # shards across the two TensorCores; switch it to pltpu.CORE_PARALLEL
        # if it does not.
        compiler_params=pltpu.CompilerParams(
            dimension_semantics=("parallel", "arbitrary"),
            vmem_limit_bytes=vmem_limit,
        ),
    )(z)
    # Per-core partials are already divided by N; off-lane-0 entries are zero.
    return jnp.sum(out)


def _simclr_loss_ref(z_i, z_j, temperature):
    """Pure-JAX reference (mirrors the PyTorch module semantics)."""
    b = z_i.shape[0]
    n = 2 * b
    z = jnp.concatenate([z_i, z_j], axis=0).astype(jnp.float32)
    norms = jnp.sqrt(jnp.sum(z * z, axis=-1, keepdims=True))
    sim = (z @ z.T) / jnp.maximum(norms * norms.T, 1e-8) / temperature
    pos = jnp.concatenate([jnp.diagonal(sim, b), jnp.diagonal(sim, -b)])
    masked = jnp.where(jnp.eye(n, dtype=bool), -jnp.inf, sim)
    lse = jax.scipy.special.logsumexp(masked, axis=-1)
    return jnp.sum(lse - pos) / n


if __name__ == "__main__":
    key = jax.random.PRNGKey(0)
    temperature = 0.5
    k1, k2, k3, k4 = jax.random.split(key, 4)

    # Case 1: tiny shapes (single tile, outer=1), default bf16 MXU path.
    z_i = jax.random.normal(k1, (4, 32), dtype=jnp.float32)
    z_j = jax.random.normal(k2, (4, 32), dtype=jnp.float32)
    loss = jax.block_until_ready(simclr_loss(z_i, z_j, temperature))
    ref = jax.block_until_ready(_simclr_loss_ref(z_i, z_j, temperature))
    assert jnp.allclose(loss, ref, atol=2e-2, rtol=2e-2), (loss, ref)

    # Case 2: row tiling + forced 2-way outer split (exercises that code path
    # even on single-TensorCore chips), bf16 MXU path.
    z_i2 = jax.random.normal(k3, (64, 32), dtype=jnp.float32)
    z_j2 = jax.random.normal(k4, (64, 32), dtype=jnp.float32)
    loss2 = jax.block_until_ready(
        simclr_loss(z_i2, z_j2, temperature, max_row_tile=32, num_cores=2))
    ref2 = jax.block_until_ready(_simclr_loss_ref(z_i2, z_j2, temperature))
    assert jnp.allclose(loss2, ref2, atol=2e-2, rtol=2e-2), (loss2, ref2)

    # Case 3: f32 MXU path, tight tolerance against the reference.
    loss3 = jax.block_until_ready(
        simclr_loss(z_i2, z_j2, temperature, matmul_dtype=jnp.float32))
    assert jnp.allclose(loss3, ref2, atol=5e-4, rtol=5e-4), (loss3, ref2)

    print("KERNEL_OK")
</pallas_src>

<mosaic_0001>
module attributes {stable_mosaic.version = 11 : i64} {
  func.func @_simclr_loss_kernel(%arg0: i32, %arg1: i32, %arg2: memref<8x32xf32, #tpu.memory_space<any>>, %arg3: memref<1x128xf32, #tpu.memory_space<vmem>>, %arg4: memref<8x32xf32, #tpu.memory_space<vmem>>, %arg5: memref<8x32xbf16, #tpu.memory_space<vmem>>, %arg6: memref<!tpu.dma_semaphore, #tpu.memory_space<semaphore_mem>>, %arg7: memref<8x1xf32, #tpu.memory_space<vmem>>) attributes {dimension_semantics = [#tpu.dimension_semantics<parallel>, #tpu.dimension_semantics<arbitrary>], iteration_bounds = array<i64: 1, 1>, scalar_prefetch = 0 : i64, scratch_operands = 4 : i64, tpu.core_type = #tpu.core_type<tc>, window_params = [{}, {transform_indices = @transform_1, window_bounds = array<i64: 1, 128>}]} {
    %c0_i32 = arith.constant 0 : i32
    %0 = arith.cmpi eq, %arg1, %c0_i32 : i32
    %1 = arith.extui %0 : i1 to i32
    %c0_i32_0 = arith.constant 0 : i32
    %2 = arith.cmpi ne, %1, %c0_i32_0 : i32
    scf.if %2 {
      tpu.enqueue_dma source(%arg2 : memref<8x32xf32, #tpu.memory_space<any>>) target(%arg4 : memref<8x32xf32, #tpu.memory_space<vmem>>) target_semaphore(%arg6 : memref<!tpu.dma_semaphore, #tpu.memory_space<semaphore_mem>>)
      tpu.wait_dma2 semaphore(%arg6 : memref<!tpu.dma_semaphore, #tpu.memory_space<semaphore_mem>>) src(%arg2 : memref<8x32xf32, #tpu.memory_space<any>>) dst(%arg4 : memref<8x32xf32, #tpu.memory_space<vmem>>)
      %c0_14 = arith.constant 0 : index
      %c0_15 = arith.constant 0 : index
      %29 = vector.load %arg4[%c0_14, %c0_15] : memref<8x32xf32, #tpu.memory_space<vmem>>, vector<8x32xf32>
      %30 = arith.mulf %29, %29 : vector<8x32xf32>
      %cst_16 = arith.constant dense<0.000000e+00> : vector<8xf32>
      %31 = vector.multi_reduction <add>, %30, %cst_16 [1] : vector<8x32xf32> to vector<8xf32>
      %32 = vector.shape_cast %31 : vector<8xf32> to vector<8x1xf32>
      %cst_17 = arith.constant 1.000000e-16 : f32
      %33 = vector.broadcast %cst_17 : f32 to vector<8x1xf32>
      %34 = arith.maximumf %32, %33 : vector<8x1xf32>
      %35 = math.rsqrt %34 : vector<8x1xf32>
      %cst_18 = arith.constant 1.41421354 : f32
      %36 = vector.broadcast %cst_18 : f32 to vector<8x1xf32>
      %37 = arith.mulf %35, %36 : vector<8x1xf32>
      %38 = vector.broadcast %37 : vector<8x1xf32> to vector<8x32xf32>
      %39 = arith.mulf %29, %38 : vector<8x32xf32>
      %40 = arith.truncf %39 : vector<8x32xf32> to vector<8x32xbf16>
      %c0_19 = arith.constant 0 : index
      %c0_20 = arith.constant 0 : index
      %41 = vector.load %arg5[%c0_19, %c0_20] : memref<8x32xbf16, #tpu.memory_space<vmem>>, vector<8x32xbf16>
      tpu.vector_store %arg5[%c0_19, %c0_20], %40 {strides = array<i32>} : memref<8x32xbf16, #tpu.memory_space<vmem>>, vector<8x32xbf16>,
      %42 = vector.extract_strided_slice %39 {offsets = [0, 0], sizes = [4, 32], strides = [1, 1]} : vector<8x32xf32> to vector<4x32xf32>
      %43 = vector.extract_strided_slice %39 {offsets = [4, 0], sizes = [4, 32], strides = [1, 1]} : vector<8x32xf32> to vector<4x32xf32>
      %44 = arith.mulf %42, %43 : vector<4x32xf32>
      %cst_21 = arith.constant dense<0.000000e+00> : vector<4xf32>
      %45 = vector.multi_reduction <add>, %44, %cst_21 [1] : vector<4x32xf32> to vector<4xf32>
      %46 = vector.shape_cast %45 : vector<4xf32> to vector<4x1xf32>
      %47 = vector.shape_cast %46 : vector<4x1xf32> to vector<1x4x1xf32>
      %cst_22 = arith.constant dense<0.000000e+00> : vector<1xf32>
      %48 = vector.multi_reduction <add>, %47, %cst_22 [1, 2] : vector<1x4x1xf32> to vector<1xf32>
      %49 = vector.shape_cast %48 : vector<1xf32> to vector<1x1x1xf32>
      %50 = vector.extract %49[0, 0, 0] : f32 from vector<1x1x1xf32>
      %cst_23 = arith.constant 2.000000e+00 : f32
      %51 = arith.mulf %50, %cst_23 : f32
      %52 = tpu.iota {dimensions = array<i32: 0>} : vector<8x1xi32>
      %c0_i32_24 = arith.constant 0 : i32
      %53 = vector.broadcast %c0_i32_24 : i32 to vector<8x1xi32>
      %54 = arith.cmpi eq, %52, %53 : vector<8x1xi32>
      %cst_25 = arith.constant 0.000000e+00 : f32
      %55 = arith.subf %cst_25, %51 : f32
      %cst_26 = arith.constant 0.000000e+00 : f32
      %56 = vector.broadcast %55 : f32 to vector<8x1xf32>
      %57 = vector.broadcast %cst_26 : f32 to vector<8x1xf32>
      %58 = arith.select %54, %56, %57 : vector<8x1xi1>, vector<8x1xf32>
      %c0_27 = arith.constant 0 : index
      %c0_28 = arith.constant 0 : index
      %59 = vector.load %arg7[%c0_27, %c0_28] : memref<8x1xf32, #tpu.memory_space<vmem>>, vector<8x1xf32>
      tpu.vector_store %arg7[%c0_27, %c0_28], %58 {strides = array<i32>} : memref<8x1xf32, #tpu.memory_space<vmem>>, vector<8x1xf32>,
      %cst_29 = arith.constant 0.000000e+00 : f32
      %60 = vector.broadcast %cst_29 : f32 to vector<1x128xf32>
      %c0_30 = arith.constant 0 : index
      %c0_31 = arith.constant 0 : index
      %61 = vector.load %arg3[%c0_30, %c0_31] : memref<1x128xf32, #tpu.memory_space<vmem>>, vector<1x128xf32>
      tpu.vector_store %arg3[%c0_30, %c0_31], %60 {strides = array<i32>} : memref<1x128xf32, #tpu.memory_space<vmem>>, vector<1x128xf32>,
    } else {
    }
    %c1_i32 = arith.constant 1 : i32
    %3 = arith.muli %arg0, %c1_i32 : i32
    %4 = arith.addi %3, %arg1 : i32
    %c8_i32 = arith.constant 8 : i32
    %5 = arith.muli %4, %c8_i32 : i32
    %6 = tpu.assume_multiple %5, 8 : i32
    %7 = arith.index_cast %6 : i32 to index
    %c0 = arith.constant 0 : index
    %8 = vector.load %arg5[%7, %c0] : memref<8x32xbf16, #tpu.memory_space<vmem>>, vector<8x32xbf16>
    %c0_1 = arith.constant 0 : index
    %c0_2 = arith.constant 0 : index
    %9 = vector.load %arg5[%c0_1, %c0_2] : memref<8x32xbf16, #tpu.memory_space<vmem>>, vector<8x32xbf16>
    "tpu.trace_start"() <{level = 10 : i32, message = "md,nd->mn"}> : () -> ()
    %cst = arith.constant dense<0.000000e+00> : vector<8x8xf32>
    %10 = tpu.matmul %8, %9, %cst {dimension_numbers = #tpu.dot_dimension_numbers<[1], [1], [0], [0], [0, 0, 1, 0], [], []>} : vector<8x32xbf16>, vector<8x32xbf16>, vector<8x8xf32> -> vector<8x8xf32>
    "tpu.trace_stop"() : () -> ()
    %cst_3 = arith.constant 2.000000e+00 : f32
    %11 = vector.broadcast %cst_3 : f32 to vector<8x8xf32>
    %12 = arith.subf %10, %11 : vector<8x8xf32>
    %13 = math.exp %12 : vector<8x8xf32>
    %cst_4 = arith.constant dense<0.000000e+00> : vector<8xf32>
    %14 = vector.multi_reduction <add>, %13, %cst_4 [1] : vector<8x8xf32> to vector<8xf32>
    %15 = vector.shape_cast %14 : vector<8xf32> to vector<8x1xf32>
    %cst_5 = arith.constant 1.000000e+00 : f32
    %16 = vector.broadcast %cst_5 : f32 to vector<8x1xf32>
    %17 = arith.subf %15, %16 : vector<8x1xf32>
    %cst_6 = arith.constant 9.99999968E-21 : f32
    %18 = vector.broadcast %cst_6 : f32 to vector<8x1xf32>
    %19 = arith.maximumf %17, %18 : vector<8x1xf32>
    %20 = math.log %19 : vector<8x1xf32>
    %cst_7 = arith.constant 2.000000e+00 : f32
    %21 = vector.broadcast %cst_7 : f32 to vector<8x1xf32>
    %22 = arith.addf %21, %20 : vector<8x1xf32>
    %c0_8 = arith.constant 0 : index
    %c0_9 = arith.constant 0 : index
    %23 = vector.load %arg7[%c0_8, %c0_9] : memref<8x1xf32, #tpu.memory_space<vmem>>, vector<8x1xf32>
    %24 = arith.addf %23, %22 : vector<8x1xf32>
    %c0_10 = arith.constant 0 : index
    %c0_11 = arith.constant 0 : index
    %25 = vector.load %arg7[%c0_10, %c0_11] : memref<8x1xf32, #tpu.memory_space<vmem>>, vector<8x1xf32>
    tpu.vector_store %arg7[%c0_10, %c0_11], %24 {strides = array<i32>} : memref<8x1xf32, #tpu.memory_space<vmem>>, vector<8x1xf32>,
    %c0_i32_12 = arith.constant 0 : i32
    %26 = arith.cmpi eq, %arg1, %c0_i32_12 : i32
    %27 = arith.extui %26 : i1 to i32
    %c0_i32_13 = arith.constant 0 : i32
    %28 = arith.cmpi ne, %27, %c0_i32_13 : i32
    scf.if %28 {
      %29 = tpu.iota {dimensions = array<i32: 1>} : vector<1x128xi32>
      %c0_14 = arith.constant 0 : index
      %c0_15 = arith.constant 0 : index
      %30 = vector.load %arg7[%c0_14, %c0_15] : memref<8x1xf32, #tpu.memory_space<vmem>>, vector<8x1xf32>
      %31 = vector.shape_cast %30 : vector<8x1xf32> to vector<1x8x1xf32>
      %cst_16 = arith.constant dense<0.000000e+00> : vector<1xf32>
      %32 = vector.multi_reduction <add>, %31, %cst_16 [1, 2] : vector<1x8x1xf32> to vector<1xf32>
      %33 = vector.shape_cast %32 : vector<1xf32> to vector<1x1x1xf32>
      %34 = vector.extract %33[0, 0, 0] : f32 from vector<1x1x1xf32>
      %cst_17 = arith.constant 8.000000e+00 : f32
      %35 = arith.divf %34, %cst_17 : f32
      %c0_i32_18 = arith.constant 0 : i32
      %36 = vector.broadcast %c0_i32_18 : i32 to vector<1x128xi32>
      %37 = arith.cmpi eq, %29, %36 : vector<1x128xi32>
      %cst_19 = arith.constant 0.000000e+00 : f32
      %38 = vector.broadcast %35 : f32 to vector<1x128xf32>
      %39 = vector.broadcast %cst_19 : f32 to vector<1x128xf32>
      %40 = arith.select %37, %38, %39 : vector<1x128xi1>, vector<1x128xf32>
      %c0_20 = arith.constant 0 : index
      %c0_21 = arith.constant 0 : index
      %41 = vector.load %arg3[%c0_20, %c0_21] : memref<1x128xf32, #tpu.memory_space<vmem>>, vector<1x128xf32>
      tpu.vector_store %arg3[%c0_20, %c0_21], %40 {strides = array<i32>} : memref<1x128xf32, #tpu.memory_space<vmem>>, vector<1x128xf32>,
    } else {
    }
    return
  }
  func.func @transform_1(%arg0: i32, %arg1: i32) -> (i32, i32) {
    %c0_i32 = arith.constant 0 : i32
    %c0_i32_0 = arith.constant 0 : i32
    return %c0_i32, %arg0 : i32, i32
  }
}

</mosaic_0001>

<bundles_post_ra>
// kernel: tpu_custom_call.1
= control target key start
LH: loop header
LB: loop body
LE: loop exit
PB: predicated region body
PF: predicated region fallthrough
CT: control target
= control target key end

     0   :  { %6 = vsyncpa [#allocation7], 0  ;;  %s249_s9 = smov [#allocation2]   ;;  %s272_s0 = inlined_call_operand.hbm [shape: f32[8,32], index: 0, kind: input, shape index: {}]   ;;  %s273_s1 = inlined_call_operand.hbm [shape: f32[1,128], index: 1, kind: output, shape index: {}]  }
   0x1   :  { %s19_s8 = sshll.u32 %s272_s0, 4  ;;  %s21_s10 = sshll.u32 %s249_s9, 4  ;;  %s20_s8 = int_to_ptr.hbm [resolvable:$true] %s19_s8  ;;  %s22_s10 = int_to_ptr.vmem [resolvable:$true] %s21_s10 }
   0x2   :  { %24 = dma.hbm_to_vmem [thread:$0]  %s20_s8, 128, %s22_s10, [#allocation4] }
   0x3   :  { %245 = dma.done.wait [#allocation4], 128 }
   0x4   :  { %246 = vsyncadd [#allocation4], 4294967168  ;;  %v28_v0 = vld [vmem:[#allocation2] sm:$0xff]  ;;  %vm30_vm0 = vcmask 261120   ;;  %vm48_vm4 = vcmask 257024   ;;  %vm57_vm5 = vcmask 3072   ;;  %v69_v38 = vlaneseq }
   0x5   :  { %v29_v1 = vmul.f32 %v28_v0, %v28_v0  ;;  %vm109_vm6 = vcmask 64512   ;;  %vm75_vm8 = vcmask 7168   ;;  %v250_v50 = vmov 8.0   ;;  %s252_s14 = smov [#allocation6]   ;;  %s158_s19 = sshll.u32 %s273_s1, 4  ;;  %s159_s19 = int_to_ptr.hbm [resolvable:$true] %s158_s19 }
   0x6   :  { %v70_v40 = vshrl.u32 %v69_v38, 7  ;;  %s156_s15 = sshll.u32 %s252_s14, 4  ;;  %s157_s15 = int_to_ptr.vmem [resolvable:$true] %s156_s15 }
   0x7   :  { %v31_v2 = vsel %vm30_vm0, %v29_v1, 0.0  ;;  %v126_v1 = vand.u32 127, %v69_v38 }
   0x8   :  { %32 = vadd.xlane.f32.xlu0 %v31_v2  ;;  %vm71_vm7 = vcmp.eq.s32.totalorder %v70_v40, 0 }
   0x9   :  { %vm147_vm10 = vcmp.eq.s32.totalorder %v126_v1, 0 }
  0x7b   :  { %v33_v3 = vpop.xlane.xlu0 %32 }
  0x7c   :  { %v34_v4 = vmax.f32 %v33_v3, 1e-16 }
  0x7e   :  { %189 = vrsqrt.f32 %v34_v4  ;;  %vm41_vm2 = vweird.f32 %v34_v4 }
  0x84   :  { %v190_v5 = vpop.eup %189 }
  0x85   :  { %v36_v6 = vmul.f32 %v190_v5, %v34_v4  ;;  %vm42_vm1 = vweird.f32 %v190_v5 }
  0x86   :  { %vm43_vm3 = vmor %vm41_vm2, %vm42_vm1 }
  0x87   :  { %v37_v7 = vmul.f32 %v190_v5, %v36_v6 }
  0x89   :  { %v38_v8 = vmul.f32 0.5, %v37_v7 }
  0x8b   :  { %v39_v9 = vsub.f32 1.5, %v38_v8 }
  0x8d   :  { %v40_v10 = vmul.f32 %v190_v5, %v39_v9 }
  0x8f   :  { %v44_v11 = vsel %vm43_vm3, %v190_v5, %v40_v10 }
  0x90   :  { %v45_v12 = vmul.f32 1.4142135, %v44_v11 }
  0x92   :  { %v46_v13 = vmul.f32 %v45_v12, %v28_v0  ;;  %v251_v0 = vmov 0.0  }
  0x93   :  { %77 = vst [vmem:[#allocation6] sm:$0x1] %v251_v0 }
  0x94   :  { %v51_v14 = vrot.slane %v46_v13, 4  ;;  %v47_v15 = vpack.c.bf16 %v46_v13, %v46_v13 }
  0x96   :  { %v53_v16 = vmul.f32 %v51_v14, %v46_v13  ;;  %49 = vst.msk [vmem:[#allocation3] sm:$0xf] %vm48_vm4, %v47_v15 }
  0x98   :  { %v54_v17 = vsel %vm48_vm4, %v53_v16, 0.0 }
  0x99   :  { %55 = vadd.xlane.f32.xlu0 %v54_v17 }
  0x9d   :  { %v85_v18 = vld [vmem:[#allocation3] sm:$0xf] }
  0x9e   :  { %v91_v19 = vsel %vm30_vm0, %v85_v18, 0  ;;  %v84_v20 = vld [vmem:[#allocation3] sm:$0xf] }
  0x9f   :  { %100 = vmatpush.bf16.xpose.msra.mxu0 %v91_v19 }
  0xa6   :  { %175 = vmatmul.msk.bf16.vlgmr.msra.gmra.mxu0 %vm30_vm0, %v84_v20 }
 0x10c   :  { %v56_v21 = vpop.xlane.xlu0 %55 }
 0x10d   :  { %v58_v22 = vsel %vm57_vm5, %v56_v21, 0.0 }
 0x10e   :  { %59 = vadd.xlane.f32.xlu1 %v58_v22 }
 0x123   :  { %v102_v23 = vpop.f32.mrf.mxu0 }
 0x124   :  { %v176_v24 = vadd.f32 -2.0, %v102_v23 }
 0x126   :  { %v107_v25 = vmul.f32 1.442695, %v176_v24 }
 0x128   :  { %191 = vpow2.f32 %v107_v25 }
 0x12b   :  { %v104_v26 = vpop.f32.mrf.mxu0 }
 0x12e   :  { %v192_v27 = vpop.eup %191 }
 0x12f   :  { %v110_v28 = vsel %vm109_vm6, %v192_v27, 0.0 }
 0x130   :  { %111 = vadd.xlane.f32.xlu1 %v110_v28 }
 0x181   :  { %v60_v29 = vpop.xlane.xlu1 %59 }
 0x182   :  { %v61_v30 = vrot.slane %v60_v29, 4 }
 0x184   :  { %v62_v31 = vadd.f32 %v61_v30, %v60_v29 }
 0x186   :  { %v63_v32 = vrot.slane %v62_v31, 2 }
 0x188   :  { %v64_v33 = vadd.f32 %v63_v32, %v62_v31 }
 0x18a   :  { %v65_v34 = vrot.slane %v64_v33, 1 }
 0x18c   :  { %v66_v35 = vadd.f32 %v65_v34, %v64_v33 }
 0x18e   :  { %179 = vpush %v66_v35 }
 0x1a3   :  { %v112_v36 = vpop.xlane.xlu1 %111 }
 0x1a4   :  { %v177_v37 = vadd.f32 -1.0, %v112_v36 }
 0x1a6   :  { %v114_v39 = vmax.f32 %v177_v37, 1e-20 }
 0x1a8   :  { %193 = vlog2.f32 %v114_v39 }
 0x1a9   :  { %195 = vrcp.f32 %v250_v50 }
 0x1ae   :  { %v194_v42 = vpop.eup %193 }
 0x1af   :  { %v116_v44 = vmul.f32 0.6931472, %v194_v42  ;;  %v196_v51 = vpop.eup %195 }
 0x1b0   :  { %v139_v52 = vmul.f32 8.0, %v196_v51  ;;  %vm143_vm9 = vweird.f32 %v196_v51 }
 0x1b1   :  { %v117_v45 = vadd.f32 2.0, %v116_v44 }
 0x1b2   :  { %v140_v53 = vsub.f32 1.0, %v139_v52 }
 0x1b4   :  { %v141_v57 = vmul.f32 %v196_v51, %v140_v53 }
 0x1b6   :  { %v142_v60 = vadd.f32 %v196_v51, %v141_v57 }
 0x1b8   :  { %v144_v63 = vsel %vm143_vm9, %v196_v51, %v142_v60 }
 0x1bf   :  { %s180_s0 = spop %179 }
 0x1c0   :  { %s68_s11 = smul.f32 2.0, %s180_s0 }
 0x1c2   :  { %s72_s12 = ssub.f32 0.0, %s68_s11 }
 0x1c4   :  { %v73_v41 = vstv %s72_s12 }
 0x1c5   :  { %v74_v43 = vsel %vm71_vm7, %v73_v41, 0.0 }
 0x1c6   :  { %76 = vst.msk [vmem:[#allocation5] sm:$0xff] %vm75_vm8, %v74_v43 }
 0x1cd   :  { %v118_v46 = vld [vmem:[#allocation5] sm:$0xff] }
 0x1ce   :  { %v119_v47 = vadd.f32 %v118_v46, %v117_v45 }
 0x1d0   :  { %121 = vst.msk [vmem:[#allocation5] sm:$0xff] %vm75_vm8, %v119_v47 }
 0x1d7   :  { %v127_v48 = vld [vmem:[#allocation5] sm:$0xff] }
 0x1d8   :  { %v128_v49 = vsel %vm75_vm8, %v127_v48, 0.0 }
 0x1d9   :  { %129 = vadd.xlane.f32.xlu2 %v128_v49 }
 0x24c   :  { %v130_v54 = vpop.xlane.xlu2 %129 }
 0x24d   :  { %v131_v55 = vrot.slane %v130_v54, 4 }
 0x24f   :  { %v132_v56 = vadd.f32 %v131_v55, %v130_v54 }
 0x251   :  { %v133_v58 = vrot.slane %v132_v56, 2 }
 0x253   :  { %v134_v59 = vadd.f32 %v133_v58, %v132_v56 }
 0x255   :  { %v135_v61 = vrot.slane %v134_v59, 1 }
 0x257   :  { %v136_v62 = vadd.f32 %v135_v61, %v134_v59 }
 0x259   :  { %181 = vpush %v136_v62 }
 0x25a   :  { %183 = vpush %v144_v63 }
 0x28a   :  { %s182_s13 = spop %181 }
 0x28b   :  { %s184_s16 = spop %183 }
 0x28c   :  { %s146_s20 = smul.f32 %s184_s16, %s182_s13 }
 0x28e   :  { %v148_v2 = vstv %s146_s20 }
 0x28f   :  { %v149_v3 = vsel %vm147_vm10, %v148_v2, 0.0 }
 0x290   :  { %150 = vst [vmem:[#allocation6] sm:$0x1] %v149_v3 }
 0x291   :  { %161 = dma.vmem_to_hbm [thread:$0]  %s157_s15, 16, %s159_s19, [#allocation7]  }
 0x292   :  { %247 = dma.done.wait [#allocation7], 16  }
 0x293   :  { %248 = vsyncadd [#allocation7], 4294967280 }
 0x294   :  { %166 = vsyncpa [#allocation7], 1 }
 0x295   :  { %167 = vsyncmov [#allocation4] }
 0x298   :  { %s168_s21 = vpop.sfrf %167 }
 0x299   :  { %p178_p0 = scmp.ne.s32.totalorder %s168_s21, 0 }
 0x29b   :  { %172 = shalt.err (%p178_p0)  }

</bundles_post_ra>
